<compile_context>
chip_gen: v5e
topology: v5e:2x2
jax: 0.10.0
libtpu: 0.0.40
codegen_flags: <defaults>
</compile_context>

<pallas_src>
import functools

import jax
import jax.numpy as jnp
from jax.experimental import pallas as pl
from jax.experimental.pallas import tpu as pltpu


_VMEM_LIMIT_BYTES = 48 * 1024 * 1024  # safe on v5e/v6e (128 MiB) and v7x (64 MiB)


def _round_up(x, m):
    return ((x + m - 1) // m) * m


def _choose_row_tile(n_rows, n_cols, max_bytes=4 * 1024 * 1024):
    """Row tile for the projection kernels: big enough to pipeline well, small enough
    that a single (tile, n_cols) f32 buffer stays under ~max_bytes (double-buffered)."""
    t = max(8, min(512, max_bytes // max(1, n_cols * 4)))
    t = (t // 8) * 8
    if n_rows <= t:
        return n_rows
    return t


def _layout_min_head_block(num_heads, head_dim):
    """Smallest head count whose lane width (Hb*D) is a multiple of 128, else all heads
    (Hb*D == E == full last dim, which is always layout-legal)."""
    for c in range(1, num_heads + 1):
        if num_heads % c == 0 and (c * head_dim) % 128 == 0:
            return c
    return num_heads


def _choose_q_tile(seq_len, max_tile=512):
    """Query tile: full sequence when small, else the largest divisor of S (multiple of 8)
    not exceeding max_tile so the per-step score working set stays bounded."""
    if seq_len <= max_tile:
        return seq_len
    for t in range(max_tile, 7, -1):
        if seq_len % t == 0 and t % 8 == 0:
            return t
    return seq_len  # no clean divisor; fall back to untiled queries


def _choose_head_block(num_heads, head_dim, seq_len, q_tile, budget_bytes=20 * 1024 * 1024):
    """Heads per attention grid step: start from the layout-minimal block, grow to
    amortize grid-step overhead while the per-step VMEM footprint stays in budget."""
    base = _layout_min_head_block(num_heads, head_dim)

    def footprint(hb):
        kv = 2 * seq_len * hb * head_dim * 4 * 2    # K+V blocks (double-buffered)
        qo = 2 * q_tile * hb * head_dim * 4 * 2     # Q+context blocks (double-buffered)
        at = hb * q_tile * seq_len * 4 * 2          # attn output block (double-buffered)
        live = 3 * q_tile * seq_len * 4             # scores/exp live values per head
        return kv + qo + at + live

    hb = base
    for c in range(base, num_heads + 1):
        if num_heads % c == 0 and c % base == 0 and footprint(c) <= budget_bytes:
            hb = c
    return hb


# ----------------------------------------------------------------------------
# Kernel 1: row-tiled low-rank (factorized) linear:  y = (x @ Vt) @ Ut + b
#   x  : (N, E_in)   Vt : (E_in, r)   Ut : (r, E_out)   b : (1, E_out)
# ----------------------------------------------------------------------------
def _factorized_linear_kernel(x_ref, vt_ref, ut_ref, b_ref, o_ref, *, compute_dtype):
    x = x_ref[...].astype(compute_dtype)
    h = jnp.dot(x, vt_ref[...].astype(compute_dtype), preferred_element_type=jnp.float32)
    y = jnp.dot(h.astype(compute_dtype), ut_ref[...].astype(compute_dtype),
                preferred_element_type=jnp.float32)
    o_ref[...] = (y + b_ref[...]).astype(o_ref.dtype)


def factorized_linear(x, vt, ut, b, compute_dtype=jnp.float32):
    N, E_in = x.shape
    r, E_out = ut.shape
    tm = _choose_row_tile(N, max(E_in, E_out))
    kernel = functools.partial(_factorized_linear_kernel, compute_dtype=compute_dtype)
    return pl.pallas_call(
        kernel,
        out_shape=jax.ShapeDtypeStruct((N, E_out), jnp.float32),
        grid=(pl.cdiv(N, tm),),
        in_specs=[
            pl.BlockSpec((tm, E_in), lambda i: (i, 0)),
            pl.BlockSpec((E_in, r), lambda i: (0, 0)),   # weights resident (fetched once)
            pl.BlockSpec((r, E_out), lambda i: (0, 0)),
            pl.BlockSpec((1, E_out), lambda i: (0, 0)),
        ],
        out_specs=pl.BlockSpec((tm, E_out), lambda i: (i, 0)),
        compiler_params=pltpu.CompilerParams(
            dimension_semantics=("parallel",),
            vmem_limit_bytes=_VMEM_LIMIT_BYTES),
    )(x, vt, ut, b.reshape(1, E_out))


# ----------------------------------------------------------------------------
# Kernel 2: fused self-attention Q/K/V projection (reads x once per row tile)
#   x : (N, E)   vt_all : (E, 3r)   ut_* : (r, E)   b_* : (1, E)
#   -> q, k, v : (N, E)
# ----------------------------------------------------------------------------
def _fused_qkv_kernel(x_ref, vt_ref, utq_ref, utk_ref, utv_ref,
                      bq_ref, bk_ref, bv_ref, q_ref, k_ref, v_ref,
                      *, rank, compute_dtype):
    x = x_ref[...].astype(compute_dtype)
    # single first-stage matmul over the stacked low-rank factors (rank is 128-aligned,
    # so the column slices below stay on lane-tile boundaries)
    h = jnp.dot(x, vt_ref[...].astype(compute_dtype),
                preferred_element_type=jnp.float32)           # (TM, 3*rank)
    h = h.astype(compute_dtype)

    def second(hs, ut_ref, b_ref):
        y = jnp.dot(hs, ut_ref[...].astype(compute_dtype),
                    preferred_element_type=jnp.float32)
        return y + b_ref[...]

    q_ref[...] = second(h[:, 0:rank], utq_ref, bq_ref).astype(q_ref.dtype)
    k_ref[...] = second(h[:, rank:2 * rank], utk_ref, bk_ref).astype(k_ref.dtype)
    v_ref[...] = second(h[:, 2 * rank:3 * rank], utv_ref, bv_ref).astype(v_ref.dtype)


def fused_qkv_projection(x, vt_all, utq, utk, utv, bq, bk, bv, compute_dtype=jnp.float32):
    N, E = x.shape
    r = utq.shape[0]
    tm = _choose_row_tile(N, E)
    kernel = functools.partial(_fused_qkv_kernel, rank=r, compute_dtype=compute_dtype)
    out_sds = jax.ShapeDtypeStruct((N, E), jnp.float32)
    row_spec = pl.BlockSpec((tm, E), lambda i: (i, 0))
    full2 = lambda shp: pl.BlockSpec(shp, lambda i: (0, 0))
    return pl.pallas_call(
        kernel,
        out_shape=(out_sds, out_sds, out_sds),
        grid=(pl.cdiv(N, tm),),
        in_specs=[
            row_spec,
            full2((E, 3 * r)),
            full2((r, E)), full2((r, E)), full2((r, E)),
            full2((1, E)), full2((1, E)), full2((1, E)),
        ],
        out_specs=(row_spec, row_spec, row_spec),
        compiler_params=pltpu.CompilerParams(
            dimension_semantics=("parallel",),
            vmem_limit_bytes=_VMEM_LIMIT_BYTES),
    )(x, vt_all, utq, utk, utv, bq.reshape(1, E), bk.reshape(1, E), bv.reshape(1, E))


# ----------------------------------------------------------------------------
# Kernel 3: causal scaled-dot-product attention.
# Grid = (batch, head-block, query-tile).  K/V blocks are indexed only by (batch, head)
# so they stay resident across the innermost query-tile axis.  Reads q/k/v directly from
# the (B, S, E) layout (head split via BlockSpec column offsets), writes the context back
# lane-dense in (B, S, E) layout, and the attention probabilities in (B*H, S, S)
# matching PyTorch's _reshape_to_batches order.
# ----------------------------------------------------------------------------
def _attention_kernel(q_ref, k_ref, v_ref, o_ref, attn_ref, *,
                      num_heads_blk, head_dim, inv_temperature, compute_dtype):
    hb, d = num_heads_blk, head_dim
    tq = q_ref.shape[1]
    s = k_ref.shape[1]
    qi = pl.program_id(2)

    # 1/temperature folded into q once for the whole head block
    q_all = q_ref[0] * inv_temperature        # (tq, Hb*D)
    k_all = k_ref[0]                          # (S,  Hb*D)
    v_all = v_ref[0]

    # causal mask for this query tile, built once per grid step
    row = jax.lax.broadcasted_iota(jnp.int32, (tq, s), 0) + qi * tq
    col = jax.lax.broadcasted_iota(jnp.int32, (tq, s), 1)
    causal = col <= row

    outs = []
    for h in range(hb):  # unrolled at trace time; hb kept modest by _choose_head_block
        lo, hi = h * d, (h + 1) * d
        qh = q_all[:, lo:hi].astype(compute_dtype)
        kh = k_all[:, lo:hi].astype(compute_dtype)
        vh = v_all[:, lo:hi].astype(compute_dtype)

        scores = jax.lax.dot_general(
            qh, kh, dimension_numbers=(((1,), (1,)), ((), ())),
            preferred_element_type=jnp.float32)               # (tq, S)
        scores = jnp.where(causal, scores, -jnp.inf)

        m = jnp.max(scores, axis=-1, keepdims=True)
        e = jnp.exp(scores - m)
        denom = jnp.sum(e, axis=-1, keepdims=True)
        attn = e * pl.reciprocal(denom, approx=False)

        out = jnp.dot(attn.astype(compute_dtype), vh,
                      preferred_element_type=jnp.float32)     # (tq, D)

        attn_ref[h] = attn.astype(attn_ref.dtype)
        outs.append(out)

    # single lane-dense store of the whole head block
    o_ref[0] = jnp.concatenate(outs, axis=-1).astype(o_ref.dtype)


def causal_attention(q, k, v, num_heads, temperature, compute_dtype=jnp.float32):
    B, S, E = q.shape
    assert E % num_heads == 0
    D = E // num_heads
    tq = _choose_q_tile(S)
    Hb = _choose_head_block(num_heads, D, S, tq)
    n_hblk = num_heads // Hb
    n_qblk = S // tq

    kernel = functools.partial(
        _attention_kernel, num_heads_blk=Hb, head_dim=D,
        inv_temperature=1.0 / float(temperature), compute_dtype=compute_dtype)

    q_spec = pl.BlockSpec((1, tq, Hb * D), lambda b, h, qi: (b, qi, h))
    kv_spec = pl.BlockSpec((1, S, Hb * D), lambda b, h, qi: (b, 0, h))  # resident over qi
    return pl.pallas_call(
        kernel,
        out_shape=(
            jax.ShapeDtypeStruct((B, S, E), jnp.float32),
            jax.ShapeDtypeStruct((B * num_heads, S, S), jnp.float32),
        ),
        grid=(B, n_hblk, n_qblk),
        in_specs=[q_spec, kv_spec, kv_spec],
        out_specs=(
            pl.BlockSpec((1, tq, Hb * D), lambda b, h, qi: (b, qi, h)),
            pl.BlockSpec((Hb, tq, S), lambda b, h, qi: (b * n_hblk + h, qi, 0)),
        ),
        compiler_params=pltpu.CompilerParams(
            dimension_semantics=("parallel", "parallel", "parallel"),
            vmem_limit_bytes=_VMEM_LIMIT_BYTES),
    )(q, k, v)


# ----------------------------------------------------------------------------
# Module wrapper (parameter setup + free reshapes only; no transposes)
# ----------------------------------------------------------------------------
class LowRankMultiheadAttentionPallas:
    def __init__(self, embedding_size, num_heads, ratio_LR=0.2, bias=True, key=None,
                 compute_dtype=jnp.float32):
        assert embedding_size % num_heads == 0
        self.E = embedding_size
        self.H = num_heads
        self.head_dim = embedding_size // num_heads
        self.temperature = float(self.head_dim ** 0.5)
        self.compute_dtype = compute_dtype  # set to jnp.bfloat16 on v6e/v7x for 2x MXU rate

        rank = max(1, int(embedding_size * ratio_LR))
        self.rank = rank
        self.rank_pad = _round_up(rank, 128)  # lane-aligned contraction dim (identical math)

        if key is None:
            key = jax.random.PRNGKey(0)
        keys = jax.random.split(key, 12)
        scale = 0.05

        def make_params(k0, k1, k2):
            vt = scale * jax.random.normal(k0, (self.E, rank), jnp.float32)
            ut = scale * jax.random.normal(k1, (rank, self.E), jnp.float32)
            b = (scale * jax.random.normal(k2, (self.E,), jnp.float32) if bias
                 else jnp.zeros((self.E,), jnp.float32))
            vt = jnp.pad(vt, ((0, 0), (0, self.rank_pad - rank)))
            ut = jnp.pad(ut, ((0, self.rank_pad - rank), (0, 0)))
            return vt, ut, b

        self.p_q = make_params(*keys[0:3])
        self.p_k = make_params(*keys[3:6])
        self.p_v = make_params(*keys[6:9])
        self.p_o = make_params(*keys[9:12])

        # stacked first-stage factor for the fused self-attention QKV projection
        self.vt_qkv = jnp.concatenate([self.p_q[0], self.p_k[0], self.p_v[0]], axis=1)

    def _proj(self, x, params):
        B, S, E = x.shape
        vt, ut, b = params
        y = factorized_linear(x.reshape(B * S, E), vt, ut, b, self.compute_dtype)
        return y.reshape(B, S, E)

    def _fused_qkv(self, x):
        B, S, E = x.shape
        q, k, v = fused_qkv_projection(
            x.reshape(B * S, E), self.vt_qkv,
            self.p_q[1], self.p_k[1], self.p_v[1],
            self.p_q[2], self.p_k[2], self.p_v[2],
            self.compute_dtype)
        return q.reshape(B, S, E), k.reshape(B, S, E), v.reshape(B, S, E)

    def __call__(self, q, k, v, mask=None):
        # NOTE: the reference ScaledDotProduct ignores `mask` and always applies a
        # causal tril mask, so `mask` is (faithfully) ignored here as well.
        if (q is k) and (k is v):
            qp, kp, vp = self._fused_qkv(q)   # self-attention: read x once
        else:
            qp = self._proj(q, self.p_q)
            kp = self._proj(k, self.p_k)
            vp = self._proj(v, self.p_v)
        out, attn = causal_attention(qp, kp, vp, self.H, self.temperature,
                                     self.compute_dtype)
        out = self._proj(out, self.p_o)
        return out, attn
        # TODO(synk): when the attn matrix is not needed by the caller, a KV-tiled
        # online-softmax (flash) variant would remove the O(S^2) VMEM/HBM footprint.


# ----------------------------------------------------------------------------
# Pure-JAX reference (mirrors the PyTorch math; padded weights give identical results)
# ----------------------------------------------------------------------------
def reference_forward(mod, q, k, v):
    def proj(x, params):
        vt, ut, b = params
        return (x @ vt) @ ut + b

    qp, kp, vp = proj(q, mod.p_q), proj(k, mod.p_k), proj(v, mod.p_v)
    B, S, E = qp.shape
    H, D = mod.H, E // mod.H

    def to_batches(x):
        return x.reshape(B, S, H, D).transpose(0, 2, 1, 3).reshape(B * H, S, D)

    qb, kb, vb = to_batches(qp), to_batches(kp), to_batches(vp)
    scores = jnp.einsum("bqd,bkd->bqk", qb, kb) / mod.temperature
    tril = jnp.tril(jnp.ones((S, S)))
    scores = jnp.where(tril == 0, -jnp.inf, scores)
    attn = jax.nn.softmax(scores, axis=-1)
    out = jnp.einsum("bqk,bkd->bqd", attn, vb)
    out = out.reshape(B, H, S, D).transpose(0, 2, 1, 3).reshape(B, S, E)
    out = proj(out, mod.p_o)
    return out, attn


if __name__ == "__main__":
    B, S, E, H = 2, 8, 32, 4  # batch, seq, embedding, heads

    key = jax.random.PRNGKey(0)
    kx, kq, kk, kv, kp = jax.random.split(key, 5)
    x_in = jax.random.normal(kx, (B, S, E), jnp.float32)
    q_in = jax.random.normal(kq, (B, S, E), jnp.float32)
    k_in = jax.random.normal(kk, (B, S, E), jnp.float32)
    v_in = jax.random.normal(kv, (B, S, E), jnp.float32)

    mod = LowRankMultiheadAttentionPallas(E, H, ratio_LR=0.2, bias=True, key=kp)

    # 1) self-attention path (fused QKV projection kernel)
    out_s, attn_s = mod(x_in, x_in, x_in)
    out_s = jax.block_until_ready(out_s)
    attn_s = jax.block_until_ready(attn_s)
    ref_out_s, ref_attn_s = reference_forward(mod, x_in, x_in, x_in)
    assert out_s.shape == (B, S, E)
    assert attn_s.shape == (B * H, S, S)
    assert jnp.allclose(out_s, ref_out_s, atol=1e-4, rtol=1e-4)
    assert jnp.allclose(attn_s, ref_attn_s, atol=1e-4, rtol=1e-4)

    # 2) cross-attention path (separate row-tiled projections)
    out_c, attn_c = mod(q_in, k_in, v_in)
    out_c = jax.block_until_ready(out_c)
    attn_c = jax.block_until_ready(attn_c)
    ref_out_c, ref_attn_c = reference_forward(mod, q_in, k_in, v_in)
    assert jnp.allclose(out_c, ref_out_c, atol=1e-4, rtol=1e-4)
    assert jnp.allclose(attn_c, ref_attn_c, atol=1e-4, rtol=1e-4)

    print("KERNEL_OK")
</pallas_src>

<mosaic_0001>
module attributes {stable_mosaic.version = 11 : i64} {
  func.func @_fused_qkv_kernel(%arg0: i32, %arg1: memref<16x32xf32, #tpu.memory_space<vmem>>, %arg2: memref<32x384xf32, #tpu.memory_space<vmem>>, %arg3: memref<128x32xf32, #tpu.memory_space<vmem>>, %arg4: memref<128x32xf32, #tpu.memory_space<vmem>>, %arg5: memref<128x32xf32, #tpu.memory_space<vmem>>, %arg6: memref<1x32xf32, #tpu.memory_space<vmem>>, %arg7: memref<1x32xf32, #tpu.memory_space<vmem>>, %arg8: memref<1x32xf32, #tpu.memory_space<vmem>>, %arg9: memref<16x32xf32, #tpu.memory_space<vmem>>, %arg10: memref<16x32xf32, #tpu.memory_space<vmem>>, %arg11: memref<16x32xf32, #tpu.memory_space<vmem>>) attributes {dimension_semantics = [#tpu.dimension_semantics<parallel>], iteration_bounds = array<i64: 1>, scalar_prefetch = 0 : i64, scratch_operands = 0 : i64, tpu.core_type = #tpu.core_type<tc>, window_params = [{transform_indices = @transform_0, window_bounds = array<i64: 16, 32>}, {pipeline_mode = #tpu.pipeline_mode<synchronous>, transform_indices = @transform_1, window_bounds = array<i64: 32, 384>}, {pipeline_mode = #tpu.pipeline_mode<synchronous>, transform_indices = @transform_2, window_bounds = array<i64: 128, 32>}, {pipeline_mode = #tpu.pipeline_mode<synchronous>, transform_indices = @transform_3, window_bounds = array<i64: 128, 32>}, {pipeline_mode = #tpu.pipeline_mode<synchronous>, transform_indices = @transform_4, window_bounds = array<i64: 128, 32>}, {pipeline_mode = #tpu.pipeline_mode<synchronous>, transform_indices = @transform_5, window_bounds = array<i64: 1, 32>}, {pipeline_mode = #tpu.pipeline_mode<synchronous>, transform_indices = @transform_6, window_bounds = array<i64: 1, 32>}, {pipeline_mode = #tpu.pipeline_mode<synchronous>, transform_indices = @transform_7, window_bounds = array<i64: 1, 32>}, {transform_indices = @transform_8, window_bounds = array<i64: 16, 32>}, {transform_indices = @transform_9, window_bounds = array<i64: 16, 32>}, {transform_indices = @transform_10, window_bounds = array<i64: 16, 32>}]} {
    %c0 = arith.constant 0 : index
    %c0_0 = arith.constant 0 : index
    %0 = vector.load %arg1[%c0, %c0_0] : memref<16x32xf32, #tpu.memory_space<vmem>>, vector<16x32xf32>
    %c0_1 = arith.constant 0 : index
    %c0_2 = arith.constant 0 : index
    %1 = vector.load %arg2[%c0_1, %c0_2] : memref<32x384xf32, #tpu.memory_space<vmem>>, vector<32x384xf32>
    %cst = arith.constant dense<0.000000e+00> : vector<16x384xf32>
    %2 = tpu.matmul %0, %1, %cst {dimension_numbers = #tpu.dot_dimension_numbers<[1], [0], [0], [1], [0, 0, 1, 1], [], []>} : vector<16x32xf32>, vector<32x384xf32>, vector<16x384xf32> -> vector<16x384xf32>
    %3 = vector.extract_strided_slice %2 {offsets = [0, 0], sizes = [16, 128], strides = [1, 1]} : vector<16x384xf32> to vector<16x128xf32>
    %c0_3 = arith.constant 0 : index
    %c0_4 = arith.constant 0 : index
    %4 = vector.load %arg3[%c0_3, %c0_4] : memref<128x32xf32, #tpu.memory_space<vmem>>, vector<128x32xf32>
    %cst_5 = arith.constant dense<0.000000e+00> : vector<16x32xf32>
    %5 = tpu.matmul %3, %4, %cst_5 {dimension_numbers = #tpu.dot_dimension_numbers<[1], [0], [0], [1], [0, 0, 1, 1], [], []>} : vector<16x128xf32>, vector<128x32xf32>, vector<16x32xf32> -> vector<16x32xf32>
    %c0_6 = arith.constant 0 : index
    %c0_7 = arith.constant 0 : index
    %6 = vector.load %arg6[%c0_6, %c0_7] : memref<1x32xf32, #tpu.memory_space<vmem>>, vector<1x32xf32>
    %7 = vector.broadcast %6 : vector<1x32xf32> to vector<16x32xf32>
    %8 = arith.addf %5, %7 : vector<16x32xf32>
    %c0_8 = arith.constant 0 : index
    %c0_9 = arith.constant 0 : index
    %9 = vector.load %arg9[%c0_8, %c0_9] : memref<16x32xf32, #tpu.memory_space<vmem>>, vector<16x32xf32>
    tpu.vector_store %arg9[%c0_8, %c0_9], %8 {strides = array<i32>} : memref<16x32xf32, #tpu.memory_space<vmem>>, vector<16x32xf32>,
    %10 = vector.extract_strided_slice %2 {offsets = [0, 128], sizes = [16, 128], strides = [1, 1]} : vector<16x384xf32> to vector<16x128xf32>
    %c0_10 = arith.constant 0 : index
    %c0_11 = arith.constant 0 : index
    %11 = vector.load %arg4[%c0_10, %c0_11] : memref<128x32xf32, #tpu.memory_space<vmem>>, vector<128x32xf32>
    %cst_12 = arith.constant dense<0.000000e+00> : vector<16x32xf32>
    %12 = tpu.matmul %10, %11, %cst_12 {dimension_numbers = #tpu.dot_dimension_numbers<[1], [0], [0], [1], [0, 0, 1, 1], [], []>} : vector<16x128xf32>, vector<128x32xf32>, vector<16x32xf32> -> vector<16x32xf32>
    %c0_13 = arith.constant 0 : index
    %c0_14 = arith.constant 0 : index
    %13 = vector.load %arg7[%c0_13, %c0_14] : memref<1x32xf32, #tpu.memory_space<vmem>>, vector<1x32xf32>
    %14 = vector.broadcast %13 : vector<1x32xf32> to vector<16x32xf32>
    %15 = arith.addf %12, %14 : vector<16x32xf32>
    %c0_15 = arith.constant 0 : index
    %c0_16 = arith.constant 0 : index
    %16 = vector.load %arg10[%c0_15, %c0_16] : memref<16x32xf32, #tpu.memory_space<vmem>>, vector<16x32xf32>
    tpu.vector_store %arg10[%c0_15, %c0_16], %15 {strides = array<i32>} : memref<16x32xf32, #tpu.memory_space<vmem>>, vector<16x32xf32>,
    %17 = vector.extract_strided_slice %2 {offsets = [0, 256], sizes = [16, 128], strides = [1, 1]} : vector<16x384xf32> to vector<16x128xf32>
    %c0_17 = arith.constant 0 : index
    %c0_18 = arith.constant 0 : index
    %18 = vector.load %arg5[%c0_17, %c0_18] : memref<128x32xf32, #tpu.memory_space<vmem>>, vector<128x32xf32>
    %cst_19 = arith.constant dense<0.000000e+00> : vector<16x32xf32>
    %19 = tpu.matmul %17, %18, %cst_19 {dimension_numbers = #tpu.dot_dimension_numbers<[1], [0], [0], [1], [0, 0, 1, 1], [], []>} : vector<16x128xf32>, vector<128x32xf32>, vector<16x32xf32> -> vector<16x32xf32>
    %c0_20 = arith.constant 0 : index
    %c0_21 = arith.constant 0 : index
    %20 = vector.load %arg8[%c0_20, %c0_21] : memref<1x32xf32, #tpu.memory_space<vmem>>, vector<1x32xf32>
    %21 = vector.broadcast %20 : vector<1x32xf32> to vector<16x32xf32>
    %22 = arith.addf %19, %21 : vector<16x32xf32>
    %c0_22 = arith.constant 0 : index
    %c0_23 = arith.constant 0 : index
    %23 = vector.load %arg11[%c0_22, %c0_23] : memref<16x32xf32, #tpu.memory_space<vmem>>, vector<16x32xf32>
    tpu.vector_store %arg11[%c0_22, %c0_23], %22 {strides = array<i32>} : memref<16x32xf32, #tpu.memory_space<vmem>>, vector<16x32xf32>,
    return
  }
  func.func @transform_0(%arg0: i32) -> (i32, i32) {
    %c0_i32 = arith.constant 0 : i32
    %c0_i32_0 = arith.constant 0 : i32
    return %arg0, %c0_i32 : i32, i32
  }
  func.func @transform_1(%arg0: i32) -> (i32, i32) {
    %c0_i32 = arith.constant 0 : i32
    %c0_i32_0 = arith.constant 0 : i32
    %c0_i32_1 = arith.constant 0 : i32
    return %c0_i32, %c0_i32_0 : i32, i32
  }
  func.func @transform_2(%arg0: i32) -> (i32, i32) {
    %c0_i32 = arith.constant 0 : i32
    %c0_i32_0 = arith.constant 0 : i32
    %c0_i32_1 = arith.constant 0 : i32
    return %c0_i32, %c0_i32_0 : i32, i32
  }
  func.func @transform_3(%arg0: i32) -> (i32, i32) {
    %c0_i32 = arith.constant 0 : i32
    %c0_i32_0 = arith.constant 0 : i32
    %c0_i32_1 = arith.constant 0 : i32
    return %c0_i32, %c0_i32_0 : i32, i32
  }
  func.func @transform_4(%arg0: i32) -> (i32, i32) {
    %c0_i32 = arith.constant 0 : i32
    %c0_i32_0 = arith.constant 0 : i32
    %c0_i32_1 = arith.constant 0 : i32
    return %c0_i32, %c0_i32_0 : i32, i32
  }
  func.func @transform_5(%arg0: i32) -> (i32, i32) {
    %c0_i32 = arith.constant 0 : i32
    %c0_i32_0 = arith.constant 0 : i32
    %c0_i32_1 = arith.constant 0 : i32
    return %c0_i32, %c0_i32_0 : i32, i32
  }
  func.func @transform_6(%arg0: i32) -> (i32, i32) {
    %c0_i32 = arith.constant 0 : i32
    %c0_i32_0 = arith.constant 0 : i32
    %c0_i32_1 = arith.constant 0 : i32
    return %c0_i32, %c0_i32_0 : i32, i32
  }
  func.func @transform_7(%arg0: i32) -> (i32, i32) {
    %c0_i32 = arith.constant 0 : i32
    %c0_i32_0 = arith.constant 0 : i32
    %c0_i32_1 = arith.constant 0 : i32
    return %c0_i32, %c0_i32_0 : i32, i32
  }
  func.func @transform_8(%arg0: i32) -> (i32, i32) {
    %c0_i32 = arith.constant 0 : i32
    %c0_i32_0 = arith.constant 0 : i32
    return %arg0, %c0_i32 : i32, i32
  }
  func.func @transform_9(%arg0: i32) -> (i32, i32) {
    %c0_i32 = arith.constant 0 : i32
    %c0_i32_0 = arith.constant 0 : i32
    return %arg0, %c0_i32 : i32, i32
  }
  func.func @transform_10(%arg0: i32) -> (i32, i32) {
    %c0_i32 = arith.constant 0 : i32
    %c0_i32_0 = arith.constant 0 : i32
    return %arg0, %c0_i32 : i32, i32
  }
}

</mosaic_0001>

<bundles_post_ra>
// kernel: tpu_custom_call.1
= control target key start
LH: loop header
LB: loop body
LE: loop exit
PB: predicated region body
PF: predicated region fallthrough
CT: control target
= control target key end

     0   :  { %16 = vsyncpa [#allocation3], 0  ;;  %vm48_vm0 = vcmask 261120   ;;  %s683_s0 = inlined_call_operand.vmem [shape: f32[16,32], index: 0, kind: input, shape index: {}]   ;;  %s684_s1 = inlined_call_operand.vmem [shape: f32[32,384], index: 1, kind: input, shape index: {}]   ;;  %s685_s2 = inlined_call_operand.vmem [shape: f32[128,32], index: 2, kind: input, shape index: {}]   ;;  %s686_s3 = inlined_call_operand.vmem [shape: f32[128,32], index: 3, kind: input, shape index: {}]   ;;  %s687_s4 = inlined_call_operand.vmem [shape: f32[128,32], index: 4, kind: input, shape index: {}]   ;;  %s688_s5 = inlined_call_operand.vmem [shape: f32[1,32], index: 5, kind: input, shape index: {}]   ;;  %s689_s6 = inlined_call_operand.vmem [shape: f32[1,32], index: 6, kind: input, shape index: {}]   ;;  %s690_s7 = inlined_call_operand.vmem [shape: f32[1,32], index: 7, kind: input, shape index: {}]   ;;  %s691_s8 = inlined_call_operand.hbm [shape: f32[16,32], index: 8, kind: output, shape index: {0}]   ;;  %s692_s9 = inlined_call_operand.hbm [shape: f32[16,32], index: 9, kind: output, shape index: {1}]   ;;  %s693_s10 = inlined_call_operand.hbm [shape: f32[16,32], index: 10, kind: output, shape index: {2}]  }
   0x1   :  { %v45_v0 = vld [vmem:[%s684_s1 + $0x48] sm:$0xff]  ;;  %v42_v1 = vld [vmem:[%s684_s1 + $0x30] sm:$0xff]  ;;  %v39_v2 = vld [vmem:[%s684_s1 + $0x18] sm:$0xff] }
   0x2   :  { %67 = vmatpush.msra.mxu2 %v45_v0  ;;  %v46_v3 = vld [vmem:[%s684_s1 + $0x50] sm:$0xff]  ;;  %v43_v4 = vld [vmem:[%s684_s1 + $0x38] sm:$0xff]  ;;  %v36_v5 = vld [vmem:[%s684_s1] sm:$0xff] }
   0x3   :  { %90 = vmatpush.msra.mxu1 %v46_v3  ;;  %v139_v6 = vld [vmem:[%s685_s2 + $0x78] sm:$0xff]  ;;  %v486_v7 = vld [vmem:[%s683_s0] sm:$0xff]  ;;  %v138_v9 = vld [vmem:[%s685_s2 + $0x70] sm:$0xff] }
   0x4   :  { %68 = vmatpush.msra.mxu2 %v42_v1  ;;  %v40_v8 = vld [vmem:[%s684_s1 + $0x20] sm:$0xff]  ;;  %144 = vmatpush.msra.mxu3 %v139_v6  ;;  %v47_v10 = vld [vmem:[%s684_s1 + $0x58] sm:$0xff]  ;;  %v137_v11 = vld [vmem:[%s685_s2 + $0x68] sm:$0xff] }
   0x5   :  { %91 = vmatpush.msra.mxu1 %v43_v4  ;;  %v37_v12 = vld [vmem:[%s684_s1 + $0x8] sm:$0xff]  ;;  %v184_v13 = vld [vmem:[%s686_s3 + $0x78] sm:$0xff]  ;;  %v44_v14 = vld [vmem:[%s684_s1 + $0x40] sm:$0xff] }
   0x6   :  { %69 = vmatpush.msra.mxu2 %v39_v2  ;;  %145 = vmatpush.msra.mxu3 %v138_v9  ;;  %v136_v15 = vld [vmem:[%s685_s2 + $0x60] sm:$0xff]  ;;  %v229_v16 = vld [vmem:[%s687_s4 + $0x78] sm:$0xff]  ;;  %v41_v17 = vld [vmem:[%s684_s1 + $0x28] sm:$0xff] }
   0x7   :  { %92 = vmatpush.msra.mxu1 %v40_v8  ;;  %189 = vmatpush.msra.mxu0 %v184_v13  ;;  %v183_v18 = vld [vmem:[%s686_s3 + $0x70] sm:$0xff]  ;;  %v135_v19 = vld [vmem:[%s685_s2 + $0x58] sm:$0xff]  ;;  %v182_v22 = vld [vmem:[%s686_s3 + $0x68] sm:$0xff] }
   0x8   :  { %70 = vmatpush.msra.mxu2 %v36_v5  ;;  %146 = vmatpush.msra.mxu3 %v137_v11  ;;  %v228_v20 = vld [vmem:[%s687_s4 + $0x70] sm:$0xff]  ;;  %v35_v23 = vld [vmem:[%s683_s0 + $0x8] sm:$0xff]  ;;  %v181_v27 = vld [vmem:[%s686_s3 + $0x60] sm:$0xff] }
   0x9   :  { %312 = vmatmul.msk.f32.vlgmr.msra.gmra.mxu2 %vm48_vm0, %v486_v7  ;;  %93 = vmatpush.msra.mxu1 %v37_v12  ;;  %v38_v21 = vld [vmem:[%s684_s1 + $0x10] sm:$0xff]  ;;  %v133_v25 = vld [vmem:[%s685_s2 + $0x48] sm:$0xff] }
   0xa   :  { %113 = vmatpush.msrb.mxu2 %v47_v10  ;;  %314 = vmatmul.msk.f32.vlgmr.msra.gmra.mxu1 %vm48_vm0, %v486_v7  ;;  %v134_v24 = vld [vmem:[%s685_s2 + $0x50] sm:$0xff]  ;;  %v227_v26 = vld [vmem:[%s687_s4 + $0x68] sm:$0xff] }
   0xb   :  { %147 = vmatpush.msra.mxu3 %v136_v15  ;;  %234 = vmatpush.msrb.mxu1 %v229_v16 }
   0xc   :  { %114 = vmatpush.msrb.mxu2 %v44_v14  ;;  %190 = vmatpush.msra.mxu0 %v183_v18 }
   0xd   :  { %148 = vmatpush.msra.mxu3 %v135_v19  ;;  %235 = vmatpush.msrb.mxu1 %v228_v20 }
   0xe   :  { %115 = vmatpush.msrb.mxu2 %v41_v17  ;;  %191 = vmatpush.msra.mxu0 %v182_v22 }
  0x10   :  { %116 = vmatpush.msrb.mxu2 %v38_v21 }
  0x11   :  { %17 = vsyncpa [#allocation5], 0  ;;  %313 = vmatmul.msk.f32.gmra.mxu2 %vm48_vm0, %v35_v23  ;;  %149 = vmatpush.msra.mxu3 %v134_v24  ;;  %v180_v28 = vld [vmem:[%s686_s3 + $0x58] sm:$0xff]  ;;  %v132_v29 = vld [vmem:[%s685_s2 + $0x40] sm:$0xff]  ;;  %s402_s29 = smov [#allocation4]   ;;  %s278_s13 = sshll.u32 %s692_s9, 4  ;;  %s279_s13 = int_to_ptr.hbm [resolvable:$true] %s278_s13 }
  0x12   :  { %236 = vmatpush.msrb.mxu1 %v227_v26  ;;  %192 = vmatpush.msra.mxu0 %v181_v27  ;;  %v226_v30 = vld [vmem:[%s687_s4 + $0x60] sm:$0xff]  ;;  %v179_v31 = vld [vmem:[%s686_s3 + $0x50] sm:$0xff]  ;;  %v131_v32 = vld [vmem:[%s685_s2 + $0x38] sm:$0xff]  ;;  %s276_s30 = sshll.u32 %s402_s29, 4  ;;  %s404_s14 = smov 8   ;;  %s277_s30 = int_to_ptr.vmem [resolvable:$true] %s276_s30 }
  0x13   :  { %150 = vmatpush.msra.mxu3 %v133_v25  ;;  %315 = vmatmul.msk.f32.gmra.mxu1 %vm48_vm0, %v35_v23  ;;  %v225_v33 = vld [vmem:[%s687_s4 + $0x58] sm:$0xff]  ;;  %v178_v34 = vld [vmem:[%s686_s3 + $0x48] sm:$0xff]  ;;  %v130_v35 = vld [vmem:[%s685_s2 + $0x30] sm:$0xff]  ;;  %s265_s18 = sshll.u32 %s691_s8, 4  ;;  %s406_s20 = smov [#allocation6]   ;;  %s266_s18 = int_to_ptr.hbm [resolvable:$true] %s265_s18 }
  0x14   :  { %193 = vmatpush.msra.mxu0 %v180_v28  ;;  %237 = vmatpush.msrb.mxu1 %v226_v30  ;;  %v224_v36 = vld [vmem:[%s687_s4 + $0x50] sm:$0xff]  ;;  %v177_v37 = vld [vmem:[%s686_s3 + $0x40] sm:$0xff]  ;;  %v129_v38 = vld [vmem:[%s685_s2 + $0x28] sm:$0xff]  ;;  %s289_s21 = sshll.u32 %s406_s20, 4  ;;  %s291_s8 = sshll.u32 %s693_s10, 4  ;;  %s290_s21 = int_to_ptr.vmem [resolvable:$true] %s289_s21  ;;  %s292_s8 = int_to_ptr.hbm [resolvable:$true] %s291_s8 }
  0x15   :  { %151 = vmatpush.msra.mxu3 %v132_v29  ;;  %v223_v39 = vld [vmem:[%s687_s4 + $0x48] sm:$0xff]  ;;  %v128_v40 = vld [vmem:[%s685_s2 + $0x20] sm:$0xff]  ;;  %v127_v41 = vld [vmem:[%s685_s2 + $0x18] sm:$0xff] }
  0x16   :  { %194 = vmatpush.msra.mxu0 %v179_v31  ;;  %238 = vmatpush.msrb.mxu1 %v225_v33  ;;  %v126_v42 = vld [vmem:[%s685_s2 + $0x10] sm:$0xff]  ;;  %v125_v43 = vld [vmem:[%s685_s2 + $0x8] sm:$0xff]  ;;  %v124_v44 = vld [vmem:[%s685_s2] sm:$0xff] }
  0x17   :  { %152 = vmatpush.msra.mxu3 %v131_v32  ;;  %v222_v45 = vld [vmem:[%s687_s4 + $0x40] sm:$0xff]  ;;  %v176_v46 = vld [vmem:[%s686_s3 + $0x38] sm:$0xff]  ;;  %v175_v48 = vld [vmem:[%s686_s3 + $0x30] sm:$0xff] }
  0x18   :  { %195 = vmatpush.msra.mxu0 %v178_v34  ;;  %239 = vmatpush.msrb.mxu1 %v224_v36  ;;  %v221_v47 = vld [vmem:[%s687_s4 + $0x38] sm:$0xff]  ;;  %v220_v49 = vld [vmem:[%s687_s4 + $0x30] sm:$0xff]  ;;  %v174_v50 = vld [vmem:[%s686_s3 + $0x28] sm:$0xff] }
  0x19   :  { %316 = vmatmul.msk.f32.vlgmr.msrb.gmra.mxu2 %vm48_vm0, %v486_v7  ;;  %153 = vmatpush.msra.mxu3 %v130_v35  ;;  %v219_v51 = vld [vmem:[%s687_s4 + $0x28] sm:$0xff]  ;;  %v173_v52 = vld [vmem:[%s686_s3 + $0x20] sm:$0xff]  ;;  %v172_v54 = vld [vmem:[%s686_s3 + $0x18] sm:$0xff] }
  0x1a   :  { %196 = vmatpush.msra.mxu0 %v177_v37  ;;  %240 = vmatpush.msrb.mxu1 %v223_v39  ;;  %v218_v53 = vld [vmem:[%s687_s4 + $0x20] sm:$0xff]  ;;  %v217_v55 = vld [vmem:[%s687_s4 + $0x18] sm:$0xff]  ;;  %v171_v56 = vld [vmem:[%s686_s3 + $0x10] sm:$0xff] }
  0x1b   :  { %154 = vmatpush.msra.mxu3 %v129_v38  ;;  %v216_v57 = vld [vmem:[%s687_s4 + $0x10] sm:$0xff]  ;;  %v170_v58 = vld [vmem:[%s686_s3 + $0x8] sm:$0xff]  ;;  %v169_v60 = vld [vmem:[%s686_s3] sm:$0xff] }
  0x1c   :  { %241 = vmatpush.msrb.mxu1 %v222_v45  ;;  %197 = vmatpush.msra.mxu0 %v176_v46  ;;  %v215_v59 = vld [vmem:[%s687_s4 + $0x8] sm:$0xff]  ;;  %v214_v61 = vld [vmem:[%s687_s4] sm:$0xff] }
  0x1d   :  { %155 = vmatpush.msra.mxu3 %v128_v40  ;;  %v324_v4 = vld [vmem:[%s689_s6] ss:$0 sm:$0xff]  ;;  %s403_s6 = smov 128  }
  0x1e   :  { %242 = vmatpush.msrb.mxu1 %v221_v47  ;;  %198 = vmatpush.msra.mxu0 %v175_v48  ;;  %v323_v7 = vld [vmem:[%s688_s5] ss:$0 sm:$0xff]  ;;  %s405_s5 = smov [#allocation2]  }
  0x1f   :  { %156 = vmatpush.msra.mxu3 %v127_v41  ;;  %s263_s15 = sshll.u32 %s405_s5, 4  ;;  %v325_v12 = vld [vmem:[%s690_s7] ss:$0 sm:$0xff]  ;;  %s264_s15 = int_to_ptr.vmem [resolvable:$true] %s263_s15 }
  0x20   :  { %243 = vmatpush.msrb.mxu1 %v220_v49  ;;  %199 = vmatpush.msra.mxu0 %v174_v50 }
  0x21   :  { %317 = vmatmul.msk.f32.gmra.mxu2 %vm48_vm0, %v35_v23  ;;  %157 = vmatpush.msra.mxu3 %v126_v42 }
  0x22   :  { %244 = vmatpush.msrb.mxu1 %v219_v51  ;;  %200 = vmatpush.msra.mxu0 %v173_v52 }
  0x23   :  { %158 = vmatpush.msra.mxu3 %v125_v43 }
  0x24   :  { %245 = vmatpush.msrb.mxu1 %v218_v53  ;;  %201 = vmatpush.msra.mxu0 %v172_v54 }
  0x25   :  { %159 = vmatpush.msra.mxu3 %v124_v44 }
  0x26   :  { %246 = vmatpush.msrb.mxu1 %v217_v55  ;;  %202 = vmatpush.msra.mxu0 %v171_v56 }
  0x28   :  { %247 = vmatpush.msrb.mxu1 %v216_v57  ;;  %203 = vmatpush.msra.mxu0 %v170_v58 }
  0x2a   :  { %248 = vmatpush.msrb.mxu1 %v215_v59  ;;  %204 = vmatpush.msra.mxu0 %v169_v60 }
  0x2c   :  { %249 = vmatpush.msrb.mxu1 %v214_v61 }
  0x87   :  { %v95_v62 = vpop.f32.mrf.mxu1 }
  0x88   :  { %205 = vmatmul.f32.vlgmr.msra.gmra.mxu0 %v95_v62 }
  0x8c   :  { %v72_v63 = vpop.f32.mrf.mxu2 }
  0x8d   :  { %160 = vmatmul.f32.vlgmr.msra.gmra.mxu3 %v72_v63 }
  0x90   :  { %v98_v0 = vpop.f32.mrf.mxu1 }
  0x91   :  { %208 = vmatmul.f32.gmra.mxu0 %v98_v0 }
  0x94   :  { %v75_v1 = vpop.f32.mrf.mxu2 }
  0x95   :  { %163 = vmatmul.f32.gmra.mxu3 %v75_v1 }
  0x9c   :  { %v118_v2 = vpop.f32.mrf.mxu2 }
  0x9d   :  { %250 = vmatmul.f32.vlgmr.msrb.gmra.mxu1 %v118_v2 }
  0xa4   :  { %v121_v3 = vpop.f32.mrf.mxu2 }
  0xa5   :  { %253 = vmatmul.f32.gmra.mxu1 %v121_v3 }
 0x105   :  { %v206_v5 = vpop.f32.mrf.mxu0 }
 0x106   :  { %v207_v6 = vadd.f32 %v324_v4, %v206_v5 }
 0x108   :  { %212 = vst.msk [vmem:[#allocation4] sm:$0xff] %vm48_vm0, %v207_v6 }
 0x10e   :  { %v209_v8 = vpop.f32.mrf.mxu0 }
 0x10f   :  { %v210_v10 = vadd.f32 %v324_v4, %v209_v8 }
 0x110   :  { %v161_v9 = vpop.f32.mrf.mxu3 }
 0x111   :  { %v162_v11 = vadd.f32 %v323_v7, %v161_v9  ;;  %213 = vst.msk [vmem:[#allocation4 + $0x8] sm:$0xff] %vm48_vm0, %v210_v10 }
 0x112   :  { %284 = dma.vmem_to_hbm [thread:$0]  %s277_s30, 256, %s279_s13, [#allocation5], %s403_s6, %s403_s6, %s404_s14  }
 0x113   :  { %167 = vst.msk [vmem:[#allocation2] sm:$0xff] %vm48_vm0, %v162_v11 }
 0x118   :  { %v164_v13 = vpop.f32.mrf.mxu3 }
 0x119   :  { %v165_v14 = vadd.f32 %v323_v7, %v164_v13 }
 0x11a   :  { %v251_v15 = vpop.f32.mrf.mxu1 }
 0x11b   :  { %168 = vst.msk [vmem:[#allocation2 + $0x8] sm:$0xff] %vm48_vm0, %v165_v14  ;;  %v252_v16 = vadd.f32 %v325_v12, %v251_v15 }
 0x11c   :  { %271 = dma.vmem_to_hbm [thread:$0]  %s264_s15, 256, %s266_s18, [#allocation3], %s403_s6, %s403_s6, %s404_s14  }
 0x11d   :  { %257 = vst.msk [vmem:[#allocation6] sm:$0xff] %vm48_vm0, %v252_v16 }
 0x122   :  { %v254_v17 = vpop.f32.mrf.mxu1 }
 0x123   :  { %v255_v18 = vadd.f32 %v325_v12, %v254_v17 }
 0x125   :  { %258 = vst.msk [vmem:[#allocation6 + $0x8] sm:$0xff] %vm48_vm0, %v255_v18 }
 0x126   :  { %297 = dma.vmem_to_hbm [thread:$0]  %s290_s21, 256, %s292_s8, [#allocation5], %s403_s6, %s403_s6, %s404_s14  }
 0x127   :  { %398 = dma.done.wait [#allocation3], 256  }
 0x128   :  { %399 = vsyncadd [#allocation3], 4294967040 }
 0x129   :  { %400 = dma.done.wait [#allocation5], 512  }
 0x12a   :  { %401 = vsyncadd [#allocation5], 4294966784 }
 0x12b   :  { %310 = vsyncpa [#allocation3], 1 }
 0x12c   :  { %311 = vsyncpa [#allocation5], 1 }

</bundles_post_ra>
